<compile_context>
chip_gen: v5e
topology: v5e:2x2
jax: 0.10.0
libtpu: 0.0.40
codegen_flags: <defaults>
</compile_context>

<pallas_src>
import jax
import jax.numpy as jnp
from jax.experimental import pallas as pl
from jax.experimental.pallas import tpu as pltpu

_HID = 8          # hidden width of both hidden layers
_OUT = 2          # logits
_SLAB_ROWS = 56   # packed parameter slab rows (see pack_params)
_SMALL_BATCH = 1024
_MIN_TILE = 1024  # only split the grid for v7x's 2nd core if tiles stay >= this


def _round_up(n, m):
    return ((n + m - 1) // m) * m


# ----------------------------------------------------------------------------
# Kernels
# ----------------------------------------------------------------------------
def mlp_lane_dense_kernel(x_ref, p_ref, o_ref):
    """Large-batch path.  Batch on the 128-lane axis; computes y^T = W^T x^T.

    x_ref: (mem_len, bt)   input tile, any dtype (cast to f32 here)
    p_ref: (56, >=128)     packed f32 parameter slab, VMEM-resident
    o_ref: (2, bt)         f32 logits^T
    """
    mem_len = x_ref.shape[0]
    x = x_ref[...].astype(jnp.float32)                     # (mem_len, bt)

    w1t = p_ref[0:8, 0:mem_len]                            # (8, mem_len)
    w2t = p_ref[8:16, 0:_HID]                              # (8, 8)
    w3t = p_ref[16:16 + _OUT, 0:_HID]                      # (2, 8)
    b1 = p_ref[24:32, 0:1]                                 # (8, 1) column form
    b2 = p_ref[32:40, 0:1]                                 # (8, 1)
    b3 = p_ref[40:40 + _OUT, 0:1]                          # (2, 1)

    h = jnp.maximum(jnp.dot(w1t, x, preferred_element_type=jnp.float32) + b1, 0.0)
    h = jnp.maximum(jnp.dot(w2t, h, preferred_element_type=jnp.float32) + b2, 0.0)
    o_ref[...] = jnp.dot(w3t, h, preferred_element_type=jnp.float32) + b3


def mlp_batch_major_kernel(x_ref, p_ref, o_ref):
    """Small-batch path.  Natural nn.Flatten layout, single launch, no grid.

    x_ref: (batch, mem_len)   o_ref: (batch, 2)
    """
    x = x_ref[...].astype(jnp.float32)                     # (B, mem_len)

    mem_len = x_ref.shape[1]
    w1t = p_ref[0:8, 0:mem_len]                            # (8, mem_len)
    w2t = p_ref[8:16, 0:_HID]                              # (8, 8)
    w3t = p_ref[16:16 + _OUT, 0:_HID]                      # (2, 8)
    brow = p_ref[48:56, 0:_HID]                            # aligned (8, 8) load
    b1r = brow[0:1, :]                                     # (1, 8) row form
    b2r = brow[1:2, :]                                     # (1, 8)
    b3r = brow[2:3, 0:_OUT]                                # (1, 2)

    # Contract the shared feature axis of x and W^T  (x @ W == x . (W^T)^T).
    dn = (((1,), (1,)), ((), ()))
    h = jnp.maximum(
        jax.lax.dot_general(x, w1t, dn, preferred_element_type=jnp.float32) + b1r, 0.0)
    h = jnp.maximum(
        jax.lax.dot_general(h, w2t, dn, preferred_element_type=jnp.float32) + b2r, 0.0)
    o_ref[...] = jax.lax.dot_general(h, w3t, dn,
                                     preferred_element_type=jnp.float32) + b3r


# ----------------------------------------------------------------------------
# Parameter packing
# ----------------------------------------------------------------------------
def pack_params(params):
    """Pack w1,b1,w2,b2,w3,b3 ((in,out)/(1,out) layout) into one f32 slab.

    Rows  0:8   W1^T (8, mem_len)      Rows 24:32  b1 column (8, 1)
    Rows  8:16  W2^T (8, 8)            Rows 32:40  b2 column (8, 1)
    Rows 16:18  W3^T (2, 8)            Rows 40:42  b3 column (2, 1)
    Row  48     b1 row (1, 8)          Row 49      b2 row (1, 8)
    Row  50     b3 row (1, 2)          (remaining rows are zero padding)
    """
    w1, b1, w2, b2, w3, b3 = (params[k] for k in ("w1", "b1", "w2", "b2", "w3", "b3"))
    mem_len = w1.shape[0]
    cols = _round_up(max(mem_len, _HID), 128)
    slab = jnp.zeros((_SLAB_ROWS, cols), jnp.float32)
    slab = slab.at[0:8, 0:mem_len].set(w1.T.astype(jnp.float32))
    slab = slab.at[8:16, 0:_HID].set(w2.T.astype(jnp.float32))
    slab = slab.at[16:16 + _OUT, 0:_HID].set(w3.T.astype(jnp.float32))
    # Column-form biases (broadcast over lanes, lane-dense path).
    slab = slab.at[24:32, 0:1].set(b1.reshape(_HID, 1).astype(jnp.float32))
    slab = slab.at[32:40, 0:1].set(b2.reshape(_HID, 1).astype(jnp.float32))
    slab = slab.at[40:40 + _OUT, 0:1].set(b3.reshape(_OUT, 1).astype(jnp.float32))
    # Row-form biases (broadcast over sublanes, small-batch path).
    slab = slab.at[48:49, 0:_HID].set(b1.reshape(1, _HID).astype(jnp.float32))
    slab = slab.at[49:50, 0:_HID].set(b2.reshape(1, _HID).astype(jnp.float32))
    slab = slab.at[50:51, 0:_OUT].set(b3.reshape(1, _OUT).astype(jnp.float32))
    return slab


# ----------------------------------------------------------------------------
# Wrappers
# ----------------------------------------------------------------------------
def _forward_small(x2d, packed_params):
    """Single-launch path for batch <= _SMALL_BATCH (the real IPD-agent case)."""
    batch = x2d.shape[0]
    return pl.pallas_call(
        mlp_batch_major_kernel,
        out_shape=jax.ShapeDtypeStruct((batch, _OUT), jnp.float32),
    )(x2d, packed_params)


def _forward_lane_dense(xt, packed_params, batch_tile):
    """Large-batch path.  xt: (mem_len, batch), batch on the lane axis."""
    mem_len, batch = xt.shape
    b128 = _round_up(batch, 128)

    # Balanced, 128-aligned tiles.  Waste from padding is < 128 cols per step
    # (never the old "round batch up to a multiple of batch_tile" behaviour).
    n_steps = pl.cdiv(b128, batch_tile)
    if n_steps == 1 and b128 >= 2 * _MIN_TILE:
        n_steps = 2          # give v7x's second TensorCore work
    bt = _round_up(pl.cdiv(b128, n_steps), 128)
    b_padded = n_steps * bt
    if b_padded != batch:
        xt = jnp.pad(xt, ((0, 0), (0, b_padded - batch)))

    in_bytes = jnp.dtype(xt.dtype).itemsize
    cost = pl.CostEstimate(
        flops=2 * b_padded * (mem_len * _HID + _HID * _HID + _HID * _OUT),
        transcendentals=0,
        bytes_accessed=b_padded * (mem_len * in_bytes + _OUT * 4)
                       + packed_params.size * 4,
    )

    out_t = pl.pallas_call(
        mlp_lane_dense_kernel,
        out_shape=jax.ShapeDtypeStruct((_OUT, b_padded), jnp.float32),
        grid_spec=pltpu.PrefetchScalarGridSpec(
            num_scalar_prefetch=0,
            grid=(n_steps,),                              # tile over batch (lanes)
            in_specs=[
                pl.BlockSpec((mem_len, bt), lambda i: (0, i)),
                # constant index_map -> weight slab stays VMEM-resident
                pl.BlockSpec(packed_params.shape, lambda i: (0, 0)),
            ],
            out_specs=pl.BlockSpec((_OUT, bt), lambda i: (0, i)),
        ),
        compiler_params=pltpu.CompilerParams(
            dimension_semantics=("parallel",)),
        cost_estimate=cost,
    )(xt, packed_params)

    return out_t[:, :batch].T                             # (batch, 2)


def neural_network_forward(x, packed_params, *, batch_tile=32768):
    """x: any shape whose trailing dims flatten to mem_len (like nn.Flatten).
    packed_params: slab from pack_params(). Returns (batch, 2) f32 logits."""
    batch = x.shape[0]
    x2d = x.reshape(batch, -1)                            # nn.Flatten (start_dim=1)
    if batch <= _SMALL_BATCH:
        return _forward_small(x2d, packed_params)
    # NOTE: for best large-batch performance feed (mem_len, batch) activations
    # directly via neural_network_forward_t and skip this transpose pass.
    return _forward_lane_dense(x2d.T, packed_params, batch_tile)


def neural_network_forward_t(xt, packed_params, *, batch_tile=32768):
    """Zero-copy large-batch entry: xt already laid out as (mem_len, batch)."""
    return _forward_lane_dense(xt, packed_params, batch_tile)


# ----------------------------------------------------------------------------
# Init + pure-JAX reference
# ----------------------------------------------------------------------------
def init_params(key, mem_len):
    """nn.Linear-style init (U(-1/sqrt(fan_in), 1/sqrt(fan_in))), (in,out) layout."""
    def linear(k, fan_in, fan_out):
        kw, kb = jax.random.split(k)
        bound = 1.0 / jnp.sqrt(jnp.float32(fan_in))
        w = jax.random.uniform(kw, (fan_in, fan_out), jnp.float32, -bound, bound)
        b = jax.random.uniform(kb, (1, fan_out), jnp.float32, -bound, bound)
        return w, b

    k1, k2, k3 = jax.random.split(key, 3)
    w1, b1 = linear(k1, mem_len, _HID)
    w2, b2 = linear(k2, _HID, _HID)
    w3, b3 = linear(k3, _HID, _OUT)
    return {"w1": w1, "b1": b1, "w2": w2, "b2": b2, "w3": w3, "b3": b3}


def reference_forward(x, params):
    x = x.astype(jnp.float32).reshape(x.shape[0], -1)
    h = jnp.maximum(x @ params["w1"] + params["b1"], 0.0)
    h = jnp.maximum(h @ params["w2"] + params["b2"], 0.0)
    return h @ params["w3"] + params["b3"]


if __name__ == "__main__":
    mem_len = 8      # memory length used by the IPD agent

    key = jax.random.PRNGKey(0)
    kparam, kdata = jax.random.split(key)
    params = init_params(kparam, mem_len)
    slab = pack_params(params)

    # 1) Small-batch path (the batch sizes the IPD agent actually uses).
    for batch in (4, 256):
        kdata, kb = jax.random.split(kdata)
        bits = jax.random.bernoulli(kb, 0.5, (batch, 1, mem_len))
        x = jnp.where(bits, 1.0, -1.0).astype(jnp.float32)   # tokenize() -> +-1

        logits = jax.block_until_ready(neural_network_forward(x, slab))
        ref = reference_forward(x, params)
        assert logits.shape == (batch, 2)
        assert jnp.allclose(logits, ref, atol=1e-4, rtol=1e-4), (
            float(jnp.max(jnp.abs(logits - ref))))

    # 2) Large-batch lane-dense path: pre-transposed (mem_len, batch) int8
    #    tokens (+-1 is exact in int8), multiple grid steps + ragged padding.
    for batch, tile in ((2048, 512), (2900, 1024)):
        kdata, kb = jax.random.split(kdata)
        bits = jax.random.bernoulli(kb, 0.5, (mem_len, batch))
        xt = jnp.where(bits, 1, -1).astype(jnp.int8)

        logits = jax.block_until_ready(
            neural_network_forward_t(xt, slab, batch_tile=tile))
        ref = reference_forward(xt.T, params)
        assert logits.shape == (batch, 2)
        assert jnp.allclose(logits, ref, atol=1e-4, rtol=1e-4), (
            float(jnp.max(jnp.abs(logits - ref))))

    print("KERNEL_OK")
</pallas_src>

<mosaic_0001>
module attributes {stable_mosaic.version = 11 : i64} {
  func.func @mlp_batch_major_kernel(%arg0: memref<4x8xf32, #tpu.memory_space<vmem>>, %arg1: memref<56x128xf32, #tpu.memory_space<vmem>>, %arg2: memref<4x2xf32, #tpu.memory_space<vmem>>) attributes {dimension_semantics = [], scalar_prefetch = 0 : i64, scratch_operands = 0 : i64, tpu.core_type = #tpu.core_type<tc>} {
    %c0 = arith.constant 0 : index
    %c0_0 = arith.constant 0 : index
    %0 = vector.load %arg0[%c0, %c0_0] : memref<4x8xf32, #tpu.memory_space<vmem>>, vector<4x8xf32>
    %c0_1 = arith.constant 0 : index
    %c0_2 = arith.constant 0 : index
    %1 = vector.load %arg1[%c0_1, %c0_2] : memref<56x128xf32, #tpu.memory_space<vmem>>, vector<8x8xf32>
    %c8 = arith.constant 8 : index
    %c0_3 = arith.constant 0 : index
    %2 = vector.load %arg1[%c8, %c0_3] : memref<56x128xf32, #tpu.memory_space<vmem>>, vector<8x8xf32>
    %c16 = arith.constant 16 : index
    %c0_4 = arith.constant 0 : index
    %3 = vector.load %arg1[%c16, %c0_4] : memref<56x128xf32, #tpu.memory_space<vmem>>, vector<2x8xf32>
    %c48 = arith.constant 48 : index
    %c0_5 = arith.constant 0 : index
    %4 = vector.load %arg1[%c48, %c0_5] : memref<56x128xf32, #tpu.memory_space<vmem>>, vector<8x8xf32>
    %5 = vector.extract_strided_slice %4 {offsets = [0, 0], sizes = [1, 8], strides = [1, 1]} : vector<8x8xf32> to vector<1x8xf32>
    %6 = vector.extract_strided_slice %4 {offsets = [1, 0], sizes = [1, 8], strides = [1, 1]} : vector<8x8xf32> to vector<1x8xf32>
    %7 = vector.extract_strided_slice %4 {offsets = [2, 0], sizes = [1, 2], strides = [1, 1]} : vector<8x8xf32> to vector<1x2xf32>
    %cst = arith.constant dense<0.000000e+00> : vector<4x8xf32>
    %8 = tpu.matmul %0, %1, %cst {dimension_numbers = #tpu.dot_dimension_numbers<[1], [1], [0], [0], [0, 0, 1, 0], [], []>} : vector<4x8xf32>, vector<8x8xf32>, vector<4x8xf32> -> vector<4x8xf32>
    %9 = vector.broadcast %5 : vector<1x8xf32> to vector<4x8xf32>
    %10 = arith.addf %8, %9 : vector<4x8xf32>
    %cst_6 = arith.constant 0.000000e+00 : f32
    %11 = vector.broadcast %cst_6 : f32 to vector<4x8xf32>
    %12 = arith.maximumf %10, %11 : vector<4x8xf32>
    %cst_7 = arith.constant dense<0.000000e+00> : vector<4x8xf32>
    %13 = tpu.matmul %12, %2, %cst_7 {dimension_numbers = #tpu.dot_dimension_numbers<[1], [1], [0], [0], [0, 0, 1, 0], [], []>} : vector<4x8xf32>, vector<8x8xf32>, vector<4x8xf32> -> vector<4x8xf32>
    %14 = vector.broadcast %6 : vector<1x8xf32> to vector<4x8xf32>
    %15 = arith.addf %13, %14 : vector<4x8xf32>
    %cst_8 = arith.constant 0.000000e+00 : f32
    %16 = vector.broadcast %cst_8 : f32 to vector<4x8xf32>
    %17 = arith.maximumf %15, %16 : vector<4x8xf32>
    %cst_9 = arith.constant dense<0.000000e+00> : vector<4x2xf32>
    %18 = tpu.matmul %17, %3, %cst_9 {dimension_numbers = #tpu.dot_dimension_numbers<[1], [1], [0], [0], [0, 0, 1, 0], [], []>} : vector<4x8xf32>, vector<2x8xf32>, vector<4x2xf32> -> vector<4x2xf32>
    %19 = vector.broadcast %7 : vector<1x2xf32> to vector<4x2xf32>
    %20 = arith.addf %18, %19 : vector<4x2xf32>
    %c0_10 = arith.constant 0 : index
    %c0_11 = arith.constant 0 : index
    %21 = vector.load %arg2[%c0_10, %c0_11] : memref<4x2xf32, #tpu.memory_space<vmem>>, vector<4x2xf32>
    tpu.vector_store %arg2[%c0_10, %c0_11], %20 {strides = array<i32>} : memref<4x2xf32, #tpu.memory_space<vmem>>, vector<4x2xf32>,
    return
  }
}

</mosaic_0001>

<bundles_post_ra>
// kernel: tpu_custom_call.1
= control target key start
LH: loop header
LB: loop body
LE: loop exit
PB: predicated region body
PF: predicated region fallthrough
CT: control target
= control target key end

     0   :  { %7 = vsyncpa [#allocation3], 0  ;;  %s234_s0 = inlined_call_operand.hbm [shape: f32[4,8], index: 0, kind: input, shape index: {}]   ;;  %s235_s1 = inlined_call_operand.hbm [shape: f32[56,128], index: 1, kind: input, shape index: {}]   ;;  %s236_s2 = inlined_call_operand.vmem [shape: f32[4,2], index: 2, kind: output, shape index: {}]  }
   0x1   :  { %s14_s11 = sshll.u32 %s234_s0, 4  ;;  %s15_s11 = int_to_ptr.hbm [resolvable:$true] %s14_s11 }
   0x2   :  { %8 = vsyncpa [#allocation5], 0  ;;  %s200_s12 = smov [#allocation2]   ;;  %s24_s16 = sshll.u32 %s235_s1, 4  ;;  %s25_s16 = int_to_ptr.hbm [resolvable:$true] %s24_s16 }
   0x3   :  { %s16_s13 = sshll.u32 %s200_s12, 4  ;;  %s201_s17 = smov [#allocation4]   ;;  %s17_s13 = int_to_ptr.vmem [resolvable:$true] %s16_s13 }
   0x4   :  { %19 = dma.hbm_to_vmem [thread:$0]  %s15_s11, 64, %s17_s13, [#allocation3]  }
   0x5   :  { %s26_s18 = sshll.u32 %s201_s17, 4  ;;  %s202_s19 = smov 128   ;;  %s27_s18 = int_to_ptr.vmem [resolvable:$true] %s26_s18 }
   0x6   :  { %s203_s20 = smov 8  }
   0x7   :  { %32 = dma.hbm_to_vmem [thread:$0]  %s25_s16, 896, %s27_s18, [#allocation5], %s202_s19, %s202_s19, %s203_s20  }
   0x8   :  { %196 = dma.done.wait [#allocation3], 64  }
   0x9   :  { %197 = vsyncadd [#allocation3], 4294967232 }
   0xa   :  { %198 = dma.done.wait [#allocation5], 896  }
   0xb   :  { %199 = vsyncadd [#allocation5], 4294966400  ;;  %vm47_vm0 = vcmask 64512   ;;  %v42_v0 = vld [vmem:[#allocation4] sm:$0xff]  ;;  %v41_v1 = vld [vmem:[#allocation2] sm:$0xf] }
   0xc   :  { %138 = vmatpush.xpose.msk.msra.mxu0 %vm47_vm0, %v42_v0  ;;  %v43_v2 = vld [vmem:[#allocation4 + $0x8] sm:$0xff]  ;;  %v45_v3 = vld [vmem:[#allocation4 + $0x30] sm:$0xff]  ;;  %vm130_vm1 = vcmask 11264  }
   0xd   :  { %140 = vmatpush.xpose.msk.msra.mxu1 %vm47_vm0, %v43_v2  ;;  %v46_v4 = vperm.slane %v45_v3, 0  ;;  %v44_v8 = vld [vmem:[#allocation4 + $0x10] sm:$0x3]  ;;  %v75_v9 = vperm.slane %v45_v3, 1  ;;  %v103_v13 = vperm.slane %v45_v3, 2 }
   0xe   :  { %142 = vmatpush.xpose.msk.msra.mxu2 %vm47_vm0, %v44_v8 }
   0xf   :  { %139 = vmatmul.msk.f32.vlgmr.msra.gmra.mxu0 %vm47_vm0, %v41_v1 }
  0x8c   :  { %v71_v5 = vpop.f32.mrf.mxu0 }
  0x8d   :  { %v72_v6 = vadd.f32 %v71_v5, %v46_v4 }
  0x8f   :  { %v74_v7 = vmax.f32 %v72_v6, 0.0 }
  0x91   :  { %141 = vmatmul.msk.f32.vlgmr.msra.gmra.mxu1 %vm47_vm0, %v74_v7 }
 0x10e   :  { %v99_v10 = vpop.f32.mrf.mxu1 }
 0x10f   :  { %v100_v11 = vadd.f32 %v99_v10, %v75_v9 }
 0x111   :  { %v102_v12 = vmax.f32 %v100_v11, 0.0 }
 0x113   :  { %143 = vmatmul.msk.f32.vlgmr.msra.gmra.mxu2 %vm47_vm0, %v102_v12 }
 0x196   :  { %v127_v14 = vpop.f32.mrf.mxu2 }
 0x197   :  { %v128_v15 = vadd.f32 %v127_v14, %v103_v13 }
 0x199   :  { %131 = vst.msk [vmem:[%s236_s2] sm:$0xf] %vm130_vm1, %v128_v15 }
 0x19a   :  { %136 = vsyncpa [#allocation3], 1 }
 0x19b   :  { %137 = vsyncpa [#allocation5], 1 }

</bundles_post_ra>
